<compile_context>
chip_gen: v7x
topology: tpu7x:2x2x1
jax: 0.10.0
libtpu: 0.0.40
codegen_flags: <defaults>
</compile_context>

<pallas_src>
import jax
import jax.numpy as jnp
from jax.experimental import pallas as pl
from jax.experimental.pallas import tpu as pltpu

D_IN, D_H1, D_H2, D_OUT = 5, 10, 20, 10


def _mlp_kernel(x_ref, w1_ref, w2_ref, w3_ref, b_ref, o_ref):
    x = x_ref[...]                                   # (5, TB)  feature-major
    b = b_ref[...]                                   # (40, 1)  packed biases
    b1 = b[0:D_H1, :]                                # (10, 1)
    b2 = b[D_H1:D_H1 + D_H2, :]                      # (20, 1)
    b3 = b[D_H1 + D_H2:, :]                          # (10, 1)

    # layer1: Linear(5 -> 10) + ReLU   (weights are (out, in); no transpose)
    h1 = jnp.dot(w1_ref[...], x, preferred_element_type=jnp.float32) + b1
    h1 = jnp.maximum(h1, 0.0)

    # layer2: Linear(10 -> 20) + Sigmoid
    h2 = jnp.dot(w2_ref[...], h1, preferred_element_type=jnp.float32) + b2
    h2 = jax.nn.sigmoid(h2)

    # layer3: Linear(20 -> 10) + Sigmoid
    h3 = jnp.dot(w3_ref[...], h2, preferred_element_type=jnp.float32) + b3
    o_ref[...] = jax.nn.sigmoid(h3).astype(o_ref.dtype)


def my_own_nn_forward(x, params, *, max_tile_b=512):
    """x: (B, 5) float32; params: dict of w1,b1,w2,b2,w3,b3 (PyTorch shapes)."""
    B = x.shape[0]
    w1, w2, w3 = params["w1"], params["w2"], params["w3"]
    # Pack biases into a single column vector [b1; b2; b3] -> (40, 1).
    b_packed = jnp.concatenate(
        [params["b1"], params["b2"], params["b3"]]).reshape(-1, 1)

    # Batch tile: multiple of 128 (lane axis), capped at max_tile_b.
    tb = min(max_tile_b, max(128, ((B + 127) // 128) * 128))
    b_pad = ((B + tb - 1) // tb) * tb
    grid = (b_pad // tb,)

    # Feature-major layout: (B, 5) -> (5, B_pad); batch lives on the lane axis.
    x_t = jnp.pad(x.T, ((0, 0), (0, b_pad - B)))

    const = lambda shape: pl.BlockSpec(shape, lambda i: (0, 0))
    out_t = pl.pallas_call(
        _mlp_kernel,
        out_shape=jax.ShapeDtypeStruct((D_OUT, b_pad), jnp.float32),
        grid_spec=pltpu.PrefetchScalarGridSpec(
            num_scalar_prefetch=0,
            grid=grid,
            in_specs=[
                pl.BlockSpec((D_IN, tb), lambda i: (0, i)),   # streamed x tile
                const(w1.shape),        # resident weights
                const(w2.shape),
                const(w3.shape),
                const(b_packed.shape),  # resident packed biases
            ],
            out_specs=pl.BlockSpec((D_OUT, tb), lambda i: (0, i)),
        ),
        compiler_params=pltpu.CompilerParams(
            dimension_semantics=("parallel",),     # both TCs on v7x
            vmem_limit_bytes=32 * 1024 * 1024,     # headroom vs v7x 64 MiB VMEM
        ),
    )(x_t, w1, w2, w3, b_packed)

    return out_t[:, :B].T                           # back to (B, 10)


def init_params(key):
    """Deterministic init matching nn.Linear shapes (weight: (out, in))."""
    ks = jax.random.split(key, 6)
    def lin(kw, kb, fan_in, fan_out):
        bound = 1.0 / jnp.sqrt(fan_in)
        w = jax.random.uniform(kw, (fan_out, fan_in), jnp.float32, -bound, bound)
        b = jax.random.uniform(kb, (fan_out,), jnp.float32, -bound, bound)
        return w, b
    w1, b1 = lin(ks[0], ks[1], D_IN, D_H1)
    w2, b2 = lin(ks[2], ks[3], D_H1, D_H2)
    w3, b3 = lin(ks[4], ks[5], D_H2, D_OUT)
    return {"w1": w1, "b1": b1, "w2": w2, "b2": b2, "w3": w3, "b3": b3}


def reference_forward(x, p):
    h1 = jnp.maximum(x @ p["w1"].T + p["b1"], 0.0)
    h2 = jax.nn.sigmoid(h1 @ p["w2"].T + p["b2"])
    return jax.nn.sigmoid(h2 @ p["w3"].T + p["b3"])


if __name__ == "__main__":
    key = jax.random.PRNGKey(0)
    kx, kp = jax.random.split(key)
    batch = 8
    x = jax.random.normal(kx, (batch, D_IN), dtype=jnp.float32)
    params = init_params(kp)

    out = jax.block_until_ready(my_own_nn_forward(x, params))
    ref = reference_forward(x, params)
    assert out.shape == (batch, D_OUT)
    assert jnp.allclose(out, ref, atol=1e-5, rtol=1e-5)
    print("KERNEL_OK")
</pallas_src>

<mosaic_0001>
module attributes {stable_mosaic.version = 11 : i64} {
  func.func @_mlp_kernel(%arg0: i32, %arg1: memref<5x128xf32, #tpu.memory_space<vmem>>, %arg2: memref<10x5xf32, #tpu.memory_space<vmem>>, %arg3: memref<20x10xf32, #tpu.memory_space<vmem>>, %arg4: memref<10x20xf32, #tpu.memory_space<vmem>>, %arg5: memref<40x1xf32, #tpu.memory_space<vmem>>, %arg6: memref<10x128xf32, #tpu.memory_space<vmem>>) attributes {dimension_semantics = [#tpu.dimension_semantics<parallel>], iteration_bounds = array<i64: 1>, scalar_prefetch = 0 : i64, scratch_operands = 0 : i64, tpu.core_type = #tpu.core_type<tc>, window_params = [{transform_indices = @transform_0, window_bounds = array<i64: 5, 128>}, {pipeline_mode = #tpu.pipeline_mode<synchronous>, transform_indices = @transform_1, window_bounds = array<i64: 10, 5>}, {pipeline_mode = #tpu.pipeline_mode<synchronous>, transform_indices = @transform_2, window_bounds = array<i64: 20, 10>}, {pipeline_mode = #tpu.pipeline_mode<synchronous>, transform_indices = @transform_3, window_bounds = array<i64: 10, 20>}, {pipeline_mode = #tpu.pipeline_mode<synchronous>, transform_indices = @transform_4, window_bounds = array<i64: 40, 1>}, {transform_indices = @transform_5, window_bounds = array<i64: 10, 128>}]} {
    %c0 = arith.constant 0 : index
    %c0_0 = arith.constant 0 : index
    %0 = vector.load %arg1[%c0, %c0_0] : memref<5x128xf32, #tpu.memory_space<vmem>>, vector<5x128xf32>
    %c0_1 = arith.constant 0 : index
    %c0_2 = arith.constant 0 : index
    %1 = vector.load %arg5[%c0_1, %c0_2] : memref<40x1xf32, #tpu.memory_space<vmem>>, vector<40x1xf32>
    %2 = vector.extract_strided_slice %1 {offsets = [0, 0], sizes = [10, 1], strides = [1, 1]} : vector<40x1xf32> to vector<10x1xf32>
    %3 = vector.extract_strided_slice %1 {offsets = [10, 0], sizes = [20, 1], strides = [1, 1]} : vector<40x1xf32> to vector<20x1xf32>
    %4 = vector.extract_strided_slice %1 {offsets = [30, 0], sizes = [10, 1], strides = [1, 1]} : vector<40x1xf32> to vector<10x1xf32>
    %c0_3 = arith.constant 0 : index
    %c0_4 = arith.constant 0 : index
    %5 = vector.load %arg2[%c0_3, %c0_4] : memref<10x5xf32, #tpu.memory_space<vmem>>, vector<10x5xf32>
    %cst = arith.constant dense<0.000000e+00> : vector<10x128xf32>
    %6 = tpu.matmul %5, %0, %cst {dimension_numbers = #tpu.dot_dimension_numbers<[1], [0], [0], [1], [0, 0, 1, 1], [], []>} : vector<10x5xf32>, vector<5x128xf32>, vector<10x128xf32> -> vector<10x128xf32>
    %7 = vector.broadcast %2 : vector<10x1xf32> to vector<10x128xf32>
    %8 = arith.addf %6, %7 : vector<10x128xf32>
    %cst_5 = arith.constant 0.000000e+00 : f32
    %9 = vector.broadcast %cst_5 : f32 to vector<10x128xf32>
    %10 = arith.maximumf %8, %9 : vector<10x128xf32>
    %c0_6 = arith.constant 0 : index
    %c0_7 = arith.constant 0 : index
    %11 = vector.load %arg3[%c0_6, %c0_7] : memref<20x10xf32, #tpu.memory_space<vmem>>, vector<20x10xf32>
    %cst_8 = arith.constant dense<0.000000e+00> : vector<20x128xf32>
    %12 = tpu.matmul %11, %10, %cst_8 {dimension_numbers = #tpu.dot_dimension_numbers<[1], [0], [0], [1], [0, 0, 1, 1], [], []>} : vector<20x10xf32>, vector<10x128xf32>, vector<20x128xf32> -> vector<20x128xf32>
    %13 = vector.broadcast %3 : vector<20x1xf32> to vector<20x128xf32>
    %14 = arith.addf %12, %13 : vector<20x128xf32>
    %15 = arith.negf %14 : vector<20x128xf32>
    %16 = math.exp %15 : vector<20x128xf32>
    %cst_9 = arith.constant 1.000000e+00 : f32
    %17 = vector.broadcast %cst_9 : f32 to vector<20x128xf32>
    %18 = arith.addf %17, %16 : vector<20x128xf32>
    %19 = arith.divf %17, %18 : vector<20x128xf32>
    %c0_10 = arith.constant 0 : index
    %c0_11 = arith.constant 0 : index
    %20 = vector.load %arg4[%c0_10, %c0_11] : memref<10x20xf32, #tpu.memory_space<vmem>>, vector<10x20xf32>
    %cst_12 = arith.constant dense<0.000000e+00> : vector<10x128xf32>
    %21 = tpu.matmul %20, %19, %cst_12 {dimension_numbers = #tpu.dot_dimension_numbers<[1], [0], [0], [1], [0, 0, 1, 1], [], []>} : vector<10x20xf32>, vector<20x128xf32>, vector<10x128xf32> -> vector<10x128xf32>
    %22 = vector.broadcast %4 : vector<10x1xf32> to vector<10x128xf32>
    %23 = arith.addf %21, %22 : vector<10x128xf32>
    %24 = arith.negf %23 : vector<10x128xf32>
    %25 = math.exp %24 : vector<10x128xf32>
    %cst_13 = arith.constant 1.000000e+00 : f32
    %26 = vector.broadcast %cst_13 : f32 to vector<10x128xf32>
    %27 = arith.addf %26, %25 : vector<10x128xf32>
    %28 = arith.divf %26, %27 : vector<10x128xf32>
    %c0_14 = arith.constant 0 : index
    %c0_15 = arith.constant 0 : index
    %29 = vector.load %arg6[%c0_14, %c0_15] : memref<10x128xf32, #tpu.memory_space<vmem>>, vector<10x128xf32>
    tpu.vector_store %arg6[%c0_14, %c0_15], %28 {strides = array<i32>} : memref<10x128xf32, #tpu.memory_space<vmem>>, vector<10x128xf32>,
    return
  }
  func.func @transform_0(%arg0: i32) -> (i32, i32) {
    %c0_i32 = arith.constant 0 : i32
    %c0_i32_0 = arith.constant 0 : i32
    return %c0_i32, %arg0 : i32, i32
  }
  func.func @transform_1(%arg0: i32) -> (i32, i32) {
    %c0_i32 = arith.constant 0 : i32
    %c0_i32_0 = arith.constant 0 : i32
    %c0_i32_1 = arith.constant 0 : i32
    return %c0_i32, %c0_i32_0 : i32, i32
  }
  func.func @transform_2(%arg0: i32) -> (i32, i32) {
    %c0_i32 = arith.constant 0 : i32
    %c0_i32_0 = arith.constant 0 : i32
    %c0_i32_1 = arith.constant 0 : i32
    return %c0_i32, %c0_i32_0 : i32, i32
  }
  func.func @transform_3(%arg0: i32) -> (i32, i32) {
    %c0_i32 = arith.constant 0 : i32
    %c0_i32_0 = arith.constant 0 : i32
    %c0_i32_1 = arith.constant 0 : i32
    return %c0_i32, %c0_i32_0 : i32, i32
  }
  func.func @transform_4(%arg0: i32) -> (i32, i32) {
    %c0_i32 = arith.constant 0 : i32
    %c0_i32_0 = arith.constant 0 : i32
    %c0_i32_1 = arith.constant 0 : i32
    return %c0_i32, %c0_i32_0 : i32, i32
  }
  func.func @transform_5(%arg0: i32) -> (i32, i32) {
    %c0_i32 = arith.constant 0 : i32
    %c0_i32_0 = arith.constant 0 : i32
    return %c0_i32, %arg0 : i32, i32
  }
}

</mosaic_0001>

<bundles_post_ra>
// kernel: tpu_custom_call.1
= control target key start
LH: loop header
LB: loop body
LE: loop exit
PB: predicated region body
PF: predicated region fallthrough
CT: control target
= control target key end

     0   :  { %vm46_vm0 = vcmask 1044480   ;;  %vm39_vm1 = vcmask 39936   ;;  %v503_v4 = vmov 0   ;;  %s607_s0 = inlined_call_operand.vmem [shape: f32[5,128], index: 0, kind: input, shape index: {}]   ;;  %s608_s1 = inlined_call_operand.vmem [shape: f32[10,5], index: 1, kind: input, shape index: {}]   ;;  %s609_s2 = inlined_call_operand.vmem [shape: f32[20,10], index: 2, kind: input, shape index: {}]   ;;  %s610_s3 = inlined_call_operand.vmem [shape: f32[10,20], index: 3, kind: input, shape index: {}]   ;;  %s611_s4 = inlined_call_operand.vmem [shape: f32[40,1], index: 4, kind: input, shape index: {}]   ;;  %s612_s5 = inlined_call_operand.hbm [shape: f32[10,128], index: 5, kind: output, shape index: {}]  }
   0x1   :  { %v21_v0 = vld [vmem:[%s607_s0] sm:$0x1f]  ;;  %v28_v2 = vld [vmem:[%s608_s1 + $0x8] sm:$0x3]  ;;  %457 = vset.pattern.permute.xlu0 %v503_v4  ;;  %v24_v5 = vld [vmem:[%s611_s4 + $0x10] sm:$0xff] }
   0x2   :  { %v27_v1 = vld [vmem:[%s608_s1] sm:$0xff]  ;;  %414 = vmatprep.subr.msk.mxu0 %vm46_vm0, %v21_v0 }
   0x3   :  { %416 = vmatprep.mubr.msk.f32.mxu0 %vm39_vm1, %v27_v1  ;;  %v22_v3 = vld [vmem:[%s611_s4] sm:$0xff]  ;;  %415 = vmatpush3.msk.msra.mxu0 %vm46_vm0, %v21_v0 }
   0x4   :  { %417 = vmatmul.mubr.msk.f32.vlgmr.msra.gmra.mrb[0].mxu0 %vm39_vm1, %v28_v2  ;;  %31 = vperm.xlu0 %457, %v22_v3  }
   0x5   :  { %10 = vsyncpa [#allocation3], 0  ;;  %458 = vset.pattern.permute.xlu1 %v503_v4  ;;  %v23_v6 = vld [vmem:[%s611_s4 + $0x8] sm:$0xff]  ;;  %v25_v7 = vld [vmem:[%s611_s4 + $0x18] sm:$0xff]  ;;  %v504_v9 = vmov 0.0|0.0   ;;  %vm505_vm2 = vmmov 0  }
   0x6   :  { %132 = vperm.xlu1 %458, %v24_v5   ;;  %v26_v8 = vld [vmem:[%s611_s4 + $0x20] sm:$0xff]  ;;  %441 = vmatprep.subr.bf16.mxu1 %v504_v9  ;;  %v506_v10 = vmov 0.0   ;;  %vm157_vm3 = vcmask 1041408   ;;  %vm507_vm4 = vmmov 1   ;;  %vm147_vm6 = vcmask 80896   ;;  %v128_v27 = vld [vmem:[%s609_s2 + $0x8] sm:$0xff] }
   0x7   :  { %423 = vmatprep.mubr.msk.f32.mxu1 %vm505_vm2, %v506_v10  ;;  %vm443_vm5 = vmpackc.low %vm157_vm3, %vm507_vm4  ;;  %v127_v26 = vld [vmem:[%s609_s2] sm:$0xff]  ;;  %v129_v28 = vld [vmem:[%s609_s2 + $0x10] sm:$0xf]  ;;  %vm270_vm7 = vcmask 162816   ;;  %vm138_vm8 = vcmask 1045504   ;;  %vm277_vm9 = vcmask 1043456  }
   0x8   :  { %36 = vperm.xlu0 %457, %v23_v6   ;;  %v259_v29 = vld [vmem:[%s610_s3] sm:$0xff]  ;;  %v260_v57 = vld [vmem:[%s610_s3 + $0x8] sm:$0x3]  ;;  %s508_s3 = smov [#allocation2]  }
   0x9   :  { %438 = vmatprep.mubr.msk.f32.mxu0 %vm270_vm7, %v259_v29  ;;  %s375_s15 = sshll.u32 %s508_s3, 4  ;;  %s376_s15 = int_to_ptr.vmem [resolvable:$true] %s375_s15 }
   0xa   :  { %136 = vperm.xlu1 %458, %v25_v7   ;;  %s479_s16 = scalar_lea.vmem %s376_s15, 256  ;;  %p484_p1 = scmp.lt.s32.totalorder %s376_s15, %s376_s15 }
   0xb   :  { %p480_p0 = scmp.ne.s32.totalorder %s376_s15, %s479_s16  ;;  %p485_p2 = scmp.lt.s32.totalorder %s479_s16, %s479_s16 }
   0xc   :  { %263 = vperm.xlu0 %457, %v26_v8  }
   0xd   :  { %p486_p3 = por %p485_p2, %p484_p1 }
   0xf   :  { %p487_p4 = pnand %p486_p3, %p480_p0 }
  0x83   :  { %v32_v11 = vpop.permute.xlu0 %31 }
  0x85   :  { %v133_v12 = vpop.permute.xlu1 %132 }
  0x86   :  { %v140_v30 = vrot.slane %v133_v12, 2 }
  0x87   :  { %v37_v13 = vpop.permute.xlu0 %36 }
  0x88   :  { %v139_v31 = vrot.slane %v37_v13, 2 }
  0x89   :  { %v137_v14 = vpop.permute.xlu1 %136 }
  0x8a   :  { %v265_v15 = vrot.slane %v137_v14, 6  ;;  %v142_v32 = vrot.slane %v137_v14, 2  ;;  %v141_v33 = vsel %vm138_vm8, %v139_v31, %v140_v30 }
  0x8b   :  { %v566_v16 = vpop.permute.xlu0 %263 }
  0x8c   :  { %v266_v17 = vrot.slane %v566_v16, 6  ;;  %v143_v38 = vsel %vm138_vm8, %v140_v30, %v142_v32 }
  0x8e   :  { %v571_v18 = vsel %vm157_vm3, %v265_v15, %v266_v17 }
  0xd7   :  { %v418_v19 = vpop.f32.mrb[0].mxu0 }
  0xd8   :  { %v122_v20 = vadd.f32 %v418_v19, %v37_v13  ;;  %v116_v21 = vpop.f32.mrb[1].mxu0 }
  0xd9   :  { %v117_v22 = vadd.f32 %v116_v21, %v32_v11 }
  0xda   :  { %v126_v23 = vmax.f32 %v122_v20, 0.0 }
  0xdb   :  { %v125_v24 = vmax.f32 %v117_v22, 0.0 }
  0xdd   :  { %v442_v25 = vpack.c.bf16 %v126_v23, %v125_v24 }
  0xdf   :  { %444 = vmatpush3.bf16.msk.msra.mxu1 %vm443_vm5, %v442_v25 }
  0xe2   :  { %424 = vmatmul.mubr.msk.f32.vlgmr.msra.gmra.mrb[0].mxu1 %vm147_vm6, %v127_v26 }
  0xe3   :  { %426 = vmatprep.mubr.msk.f32.mxu1 %vm505_vm2, %v506_v10 }
  0xe6   :  { %427 = vmatmul.mubr.msk.f32.gmra.mrb[2].mxu1 %vm147_vm6, %v128_v27 }
  0xe7   :  { %429 = vmatprep.mubr.msk.f32.mxu1 %vm505_vm2, %v506_v10 }
  0xea   :  { %430 = vmatmul.mubr.msk.f32.gmra.mrb[4].mxu1 %vm147_vm6, %v129_v28 }
 0x1b5   :  { %v227_v34 = vpop.f32.mrb[0].mxu1 }
 0x1b6   :  { %v228_v35 = vadd.f32 %v227_v34, %v141_v33  ;;  %v425_v36 = vpop.f32.mrb[1].mxu1 }
 0x1b8   :  { %v393_v37 = vmul.f32 -1.442695, %v228_v35 }
 0x1b9   :  { %v232_v39 = vpop.f32.mrb[2].mxu1 }
 0x1ba   :  { %459 = vpow2.f32 %v393_v37  ;;  %v233_v40 = vadd.f32 %v232_v39, %v143_v38  ;;  %v428_v41 = vpop.f32.mrb[3].mxu1 }
 0x1bc   :  { %v394_v42 = vmul.f32 -1.442695, %v233_v40 }
 0x1bd   :  { %v237_v43 = vpop.f32.mrb[4].mxu1 }
 0x1be   :  { %461 = vpow2.f32 %v394_v42  ;;  %v238_v44 = vadd.f32 %v237_v43, %v142_v32  ;;  %v431_v45 = vpop.f32.mrb[5].mxu1 }
 0x1c0   :  { %v395_v46 = vmul.f32 -1.442695, %v238_v44 }
 0x1c2   :  { %463 = vpow2.f32 %v395_v46 }
 0x1c4   :  { %v460_v47 = vpop.eup %459 }
 0x1c5   :  { %v250_v48 = vadd.f32 1.0, %v460_v47 }
 0x1c7   :  { %465 = vrcp.f32 %v250_v48 }
 0x1c8   :  { %v462_v49 = vpop.eup %461 }
 0x1c9   :  { %v251_v50 = vadd.f32 1.0, %v462_v49 }
 0x1cb   :  { %467 = vrcp.f32 %v251_v50 }
 0x1cc   :  { %v464_v51 = vpop.eup %463 }
 0x1cd   :  { %v252_v52 = vadd.f32 1.0, %v464_v51 }
 0x1cf   :  { %469 = vrcp.f32 %v252_v52 }
 0x1d1   :  { %v466_v53 = vpop.eup %465 }
 0x1d5   :  { %v468_v54 = vpop.eup %467 }
 0x1d6   :  { %v445_v55 = vpack.c.bf16 %v468_v54, %v466_v53 }
 0x1d8   :  { %446 = vmatprep.subr.bf16.mxu0 %v445_v55 }
 0x1d9   :  { %v470_v56 = vpop.eup %469  ;;  %448 = vmatpush3.bf16.msra.mxu0 %v445_v55 }
 0x1da   :  { %436 = vmatprep.subr.msk.mxu0 %vm277_vm9, %v470_v56 }
 0x1dd   :  { %437 = vmatpush3.msk.msra.mxu0 %vm277_vm9, %v470_v56 }
 0x1de   :  { %439 = vmatmul.mubr.msk.f32.vlgmr.msra.gmra.mrb[2].mxu0 %vm270_vm7, %v260_v57 }
 0x2b1   :  { %v440_v58 = vpop.f32.mrb[2].mxu0 }
 0x2b2   :  { %v353_v59 = vadd.f32 %v440_v58, %v266_v17  ;;  %v347_v60 = vpop.f32.mrb[3].mxu0 }
 0x2b3   :  { %v348_v61 = vadd.f32 %v347_v60, %v571_v18 }
 0x2b4   :  { %v400_v62 = vmul.f32 -1.442695, %v353_v59 }
 0x2b5   :  { %v399_v63 = vmul.f32 -1.442695, %v348_v61 }
 0x2b6   :  { %471 = vpow2.f32 %v400_v62 }
 0x2b7   :  { %473 = vpow2.f32 %v399_v63 }
 0x2c0   :  { %v472_v0 = vpop.eup %471 }
 0x2c1   :  { %v474_v1 = vpop.eup %473  ;;  %v363_v2 = vadd.f32 1.0, %v472_v0 }
 0x2c2   :  { %v362_v3 = vadd.f32 1.0, %v474_v1 }
 0x2c3   :  { %475 = vrcp.f32 %v363_v2 }
 0x2c4   :  { %477 = vrcp.f32 %v362_v3 }
 0x2cd   :  { %v476_v4 = vpop.eup %475 }
 0x2ce   :  { %v478_v5 = vpop.eup %477  ;;  %369 = vst [vmem:[#allocation2 + $0x8] sm:$0x3] %v476_v4 }
 0x2cf   :  { %368 = vst [vmem:[#allocation2] sm:$0xff] %v478_v5 }
 0x2d0   :  { %490 = shalt.err (!%p487_p4)
}
 0x2d1   :  { %s491_s19 = scalar_lea.hbm %s612_s5, 256 }
 0x2d2   :  { %p492_p5 = scmp.ne.s32.totalorder %s612_s5, %s491_s19  ;;  %p495_p6 = scmp.lt.u32.totalorder %s491_s19, %s612_s5 }
 0x2d4   :  { %p497_p7 = pnand %p495_p6, %p492_p5 }
 0x2d6   :  { %500 = shalt.err (!%p497_p7)
}
 0x2d7   :  { %s509_s24 = smov 128   ;;  %s510_s25 = smov 8  }
 0x2d8   :  { %381 = dma.vmem_to_hbm [thread:$0]  %s376_s15, 256, %s612_s5, [#allocation3], %s509_s24, %s509_s24, %s510_s25  }
 0x2d9   :  { %501 = dma.done.wait [#allocation3], 256  }
 0x2da   :  { %502 = vsyncadd [#allocation3], 4294967040 }
 0x2db   :  { %385 = vsyncpa [#allocation3], 1 }

</bundles_post_ra>
